<compile_context>
chip_gen: v6e
topology: v6e:2x2x1
jax: 0.10.0
libtpu: 0.0.40
codegen_flags: <defaults>
</compile_context>

<pallas_src>
import functools
import math

import jax
import jax.numpy as jnp
from jax import lax
from jax.experimental import pallas as pl
from jax.experimental.pallas import tpu as pltpu


def _sdpa_kernel(q_ref, kv_ref, out_ref, attn_ref, *, inv_scale):
    # q_ref:   (TB, TQ, H)  streaming query tile
    # kv_ref:  (TB, S,  H)  full keys/values for this batch tile (resident
    #                       across the inner query-tile grid axis)
    # out_ref: (TB, TQ, H)  weighted sum
    # attn_ref:(TB, TQ, S)  attention weights
    q = (q_ref[...] * inv_scale).astype(jnp.bfloat16)   # fold 1/sqrt(H) into Q
    kv = kv_ref[...].astype(jnp.bfloat16)

    # scores = Q @ K^T : contract on H, batch on TB -- no explicit transpose.
    scores = lax.dot_general(
        q, kv,
        dimension_numbers=(((2,), (2,)), ((0,), (0,))),
        preferred_element_type=jnp.float32,
    )  # (TB, TQ, S), f32

    # Numerically-stable softmax along the key axis, in f32.
    m = jnp.max(scores, axis=-1, keepdims=True)
    e = jnp.exp(scores - m)
    denom = jnp.sum(e, axis=-1, keepdims=True)
    r = pl.reciprocal(denom, approx=True)        # EUP vrcp (otherwise-idle slot)
    r = r * (2.0 - denom * r)                    # one Newton step -> ~exact
    attn = e * r                                 # (TB, TQ, S), rows sum to 1

    # weighted_sum = attn @ V
    weighted = lax.dot_general(
        attn.astype(jnp.bfloat16), kv,
        dimension_numbers=(((2,), (1,)), ((0,), (0,))),
        preferred_element_type=jnp.float32,
    )  # (TB, TQ, H), f32

    out_ref[...] = weighted.astype(out_ref.dtype)
    attn_ref[...] = attn.astype(attn_ref.dtype)


def _choose_tiles(B, S, H):
    """Pick (TB, TQ). TQ always divides S; TB always divides B."""
    # Query tile: keep whole S for short sequences; otherwise a 128-multiple
    # that divides S so no tail-tile masking is needed.
    TQ = S
    if S > 512:
        for cand in (512, 256, 128):
            if S % cand == 0:
                TQ = cand
                break
        # TODO(synk): sequences > 512 not divisible by 128 fall back to one
        # query tile; a masked tail tile would be needed to tile such shapes.

    # Batch tile: pack several batch elements per grid step when the
    # per-batch problem is tiny (fills the MXU / amortizes per-step overhead).
    if S * H <= 128 * 128:
        TB = min(B, max(1, (128 * 128) // max(S * H, 1)))
    else:
        TB = 1
    while B % TB != 0:
        TB -= 1
    return TB, TQ


def scaled_dot_product_attention(lstm_output):
    """lstm_output: (B, S, H). Returns (weighted_sum (B,S,H), attn (B,S,S))."""
    B, S, H = lstm_output.shape
    inv_scale = 1.0 / math.sqrt(float(H))
    TB, TQ = _choose_tiles(B, S, H)

    kernel = functools.partial(_sdpa_kernel, inv_scale=inv_scale)

    return pl.pallas_call(
        kernel,
        out_shape=(
            jax.ShapeDtypeStruct((B, S, H), lstm_output.dtype),
            jax.ShapeDtypeStruct((B, S, S), lstm_output.dtype),
        ),
        grid_spec=pltpu.PrefetchScalarGridSpec(
            num_scalar_prefetch=0,
            grid=(B // TB, S // TQ),
            in_specs=[
                # Streaming query tile.
                pl.BlockSpec((TB, TQ, H), lambda bi, qi: (bi, qi, 0)),
                # Full-length K/V, resident across the query-tile axis.
                pl.BlockSpec((TB, S, H), lambda bi, qi: (bi, 0, 0)),
            ],
            out_specs=[
                pl.BlockSpec((TB, TQ, H), lambda bi, qi: (bi, qi, 0)),
                pl.BlockSpec((TB, TQ, S), lambda bi, qi: (bi, qi, 0)),
            ],
        ),
        compiler_params=pltpu.CompilerParams(
            dimension_semantics=("parallel", "parallel"),
            vmem_limit_bytes=48 * 1024 * 1024,
        ),
    )(lstm_output, lstm_output)


if __name__ == "__main__":
    # Small deterministic example consistent with the module: batch=2, seq=8, hidden=32
    B, S, H = 2, 8, 32
    key = jax.random.PRNGKey(0)
    lstm_output = jax.random.normal(key, (B, S, H), dtype=jnp.float32)

    weighted_sum, attention_weights = scaled_dot_product_attention(lstm_output)
    jax.block_until_ready((weighted_sum, attention_weights))

    inv_scale = 1.0 / math.sqrt(float(H))

    # Reference with the same bf16 MXU operand casting the kernel uses
    # (isolates kernel mechanics; tolerances stay tight).
    q_ref = (lstm_output * inv_scale).astype(jnp.bfloat16).astype(jnp.float32)
    kv_ref = lstm_output.astype(jnp.bfloat16).astype(jnp.float32)
    scores_ref = jnp.einsum("bqh,bkh->bqk", q_ref, kv_ref)
    attn_ref = jax.nn.softmax(scores_ref, axis=-1)
    ws_ref = jnp.einsum(
        "bqk,bkh->bqh", attn_ref.astype(jnp.bfloat16).astype(jnp.float32), kv_ref
    )
    assert jnp.allclose(attention_weights, attn_ref, atol=2e-2, rtol=2e-2)
    assert jnp.allclose(weighted_sum, ws_ref, atol=2e-2, rtol=2e-2)

    # Sanity vs the exact f32 math of the PyTorch module (loose bf16 tolerance).
    scores_f32 = jnp.einsum("bqh,bkh->bqk", lstm_output, lstm_output) * inv_scale
    attn_f32 = jax.nn.softmax(scores_f32, axis=-1)
    ws_f32 = jnp.einsum("bqk,bkh->bqh", attn_f32, lstm_output)
    assert jnp.allclose(attention_weights, attn_f32, atol=1e-1)
    assert jnp.allclose(weighted_sum, ws_f32, atol=1e-1)

    print("KERNEL_OK")
</pallas_src>

<mosaic_0001>
module attributes {stable_mosaic.version = 11 : i64} {
  func.func @_sdpa_kernel(%arg0: i32, %arg1: i32, %arg2: memref<2x8x32xf32, #tpu.memory_space<vmem>>, %arg3: memref<2x8x32xf32, #tpu.memory_space<vmem>>, %arg4: memref<2x8x32xf32, #tpu.memory_space<vmem>>, %arg5: memref<2x8x8xf32, #tpu.memory_space<vmem>>) attributes {dimension_semantics = [#tpu.dimension_semantics<parallel>, #tpu.dimension_semantics<parallel>], iteration_bounds = array<i64: 1, 1>, scalar_prefetch = 0 : i64, scratch_operands = 0 : i64, tpu.core_type = #tpu.core_type<tc>, window_params = [{transform_indices = @transform_0, window_bounds = array<i64: 2, 8, 32>}, {transform_indices = @transform_1, window_bounds = array<i64: 2, 8, 32>}, {transform_indices = @transform_2, window_bounds = array<i64: 2, 8, 32>}, {transform_indices = @transform_3, window_bounds = array<i64: 2, 8, 8>}]} {
    %c0 = arith.constant 0 : index
    %c0_0 = arith.constant 0 : index
    %c0_1 = arith.constant 0 : index
    %0 = vector.load %arg2[%c0, %c0_0, %c0_1] : memref<2x8x32xf32, #tpu.memory_space<vmem>>, vector<2x8x32xf32>
    %cst = arith.constant 0.176776692 : f32
    %1 = vector.broadcast %cst : f32 to vector<2x8x32xf32>
    %2 = arith.mulf %0, %1 : vector<2x8x32xf32>
    %3 = arith.truncf %2 : vector<2x8x32xf32> to vector<2x8x32xbf16>
    %c0_2 = arith.constant 0 : index
    %c0_3 = arith.constant 0 : index
    %c0_4 = arith.constant 0 : index
    %4 = vector.load %arg3[%c0_2, %c0_3, %c0_4] : memref<2x8x32xf32, #tpu.memory_space<vmem>>, vector<2x8x32xf32>
    %5 = arith.truncf %4 : vector<2x8x32xf32> to vector<2x8x32xbf16>
    %cst_5 = arith.constant dense<0.000000e+00> : vector<2x8x8xf32>
    %6 = tpu.matmul %3, %5, %cst_5 {dimension_numbers = #tpu.dot_dimension_numbers<[2], [2], [1], [1], [0, 0, 0, 1, 1, 1], [0], [0]>} : vector<2x8x32xbf16>, vector<2x8x32xbf16>, vector<2x8x8xf32> -> vector<2x8x8xf32>
    %cst_6 = arith.constant dense<0xFF800000> : vector<2x8xf32>
    %7 = vector.multi_reduction <maximumf>, %6, %cst_6 [2] : vector<2x8x8xf32> to vector<2x8xf32>
    %8 = vector.shape_cast %7 : vector<2x8xf32> to vector<2x8x1xf32>
    %9 = vector.broadcast %8 : vector<2x8x1xf32> to vector<2x8x8xf32>
    %10 = arith.subf %6, %9 : vector<2x8x8xf32>
    %11 = math.exp %10 : vector<2x8x8xf32>
    %cst_7 = arith.constant dense<0.000000e+00> : vector<2x8xf32>
    %12 = vector.multi_reduction <add>, %11, %cst_7 [2] : vector<2x8x8xf32> to vector<2x8xf32>
    %13 = vector.shape_cast %12 : vector<2x8xf32> to vector<2x8x1xf32>
    %14 = tpu.reciprocal %13 {approx = true} : vector<2x8x1xf32> -> vector<2x8x1xf32>
    %15 = arith.mulf %13, %14 : vector<2x8x1xf32>
    %cst_8 = arith.constant 2.000000e+00 : f32
    %16 = vector.broadcast %cst_8 : f32 to vector<2x8x1xf32>
    %17 = arith.subf %16, %15 : vector<2x8x1xf32>
    %18 = arith.mulf %14, %17 : vector<2x8x1xf32>
    %19 = vector.broadcast %18 : vector<2x8x1xf32> to vector<2x8x8xf32>
    %20 = arith.mulf %11, %19 : vector<2x8x8xf32>
    %21 = arith.truncf %20 : vector<2x8x8xf32> to vector<2x8x8xbf16>
    %cst_9 = arith.constant dense<0.000000e+00> : vector<2x8x32xf32>
    %22 = tpu.matmul %21, %5, %cst_9 {dimension_numbers = #tpu.dot_dimension_numbers<[2], [1], [1], [2], [0, 0, 0, 1, 1, 2], [0], [0]>} : vector<2x8x8xbf16>, vector<2x8x32xbf16>, vector<2x8x32xf32> -> vector<2x8x32xf32>
    %c0_10 = arith.constant 0 : index
    %c0_11 = arith.constant 0 : index
    %c0_12 = arith.constant 0 : index
    %23 = vector.load %arg4[%c0_10, %c0_11, %c0_12] : memref<2x8x32xf32, #tpu.memory_space<vmem>>, vector<2x8x32xf32>
    tpu.vector_store %arg4[%c0_10, %c0_11, %c0_12], %22 {strides = array<i32>} : memref<2x8x32xf32, #tpu.memory_space<vmem>>, vector<2x8x32xf32>,
    %c0_13 = arith.constant 0 : index
    %c0_14 = arith.constant 0 : index
    %c0_15 = arith.constant 0 : index
    %24 = vector.load %arg5[%c0_13, %c0_14, %c0_15] : memref<2x8x8xf32, #tpu.memory_space<vmem>>, vector<2x8x8xf32>
    tpu.vector_store %arg5[%c0_13, %c0_14, %c0_15], %20 {strides = array<i32>} : memref<2x8x8xf32, #tpu.memory_space<vmem>>, vector<2x8x8xf32>,
    return
  }
  func.func @transform_0(%arg0: i32, %arg1: i32) -> (i32, i32, i32) {
    %c0_i32 = arith.constant 0 : i32
    %c0_i32_0 = arith.constant 0 : i32
    return %arg0, %arg1, %c0_i32 : i32, i32, i32
  }
  func.func @transform_1(%arg0: i32, %arg1: i32) -> (i32, i32, i32) {
    %c0_i32 = arith.constant 0 : i32
    %c0_i32_0 = arith.constant 0 : i32
    %c0_i32_1 = arith.constant 0 : i32
    return %arg0, %c0_i32, %c0_i32_0 : i32, i32, i32
  }
  func.func @transform_2(%arg0: i32, %arg1: i32) -> (i32, i32, i32) {
    %c0_i32 = arith.constant 0 : i32
    %c0_i32_0 = arith.constant 0 : i32
    return %arg0, %arg1, %c0_i32 : i32, i32, i32
  }
  func.func @transform_3(%arg0: i32, %arg1: i32) -> (i32, i32, i32) {
    %c0_i32 = arith.constant 0 : i32
    %c0_i32_0 = arith.constant 0 : i32
    return %arg0, %arg1, %c0_i32 : i32, i32, i32
  }
}

</mosaic_0001>

<bundles_post_ra>
// kernel: tpu_custom_call.1
= control target key start
LH: loop header
LB: loop body
LE: loop exit
PB: predicated region body
PF: predicated region fallthrough
CT: control target
= control target key end

     0   :  { %9 = vsyncpa [#allocation3], 0  ;;  %s517_s0 = inlined_call_operand.hbm [shape: f32[2,8,32], index: 0, kind: input, shape index: {}]   ;;  %s518_s1 = inlined_call_operand.hbm [shape: f32[2,8,32], index: 1, kind: input, shape index: {}]   ;;  %s519_s2 = inlined_call_operand.hbm [shape: f32[2,8,32], index: 2, kind: output, shape index: {0}]   ;;  %s520_s3 = inlined_call_operand.hbm [shape: f32[2,8,8], index: 3, kind: output, shape index: {1}]  }
   0x1   :  { %10 = vsyncpa [#allocation6], 0 }
   0x2   :  { %11 = vsyncpa [#allocation4], 0 }
   0x3   :  { %12 = vsyncpa [#allocation9], 0  ;;  %s447_s12 = smov [#allocation2]  }
   0x4   :  { %s18_s13 = sshll.u32 %s447_s12, 4  ;;  %s19_s13 = int_to_ptr.vmem [resolvable:$true] %s18_s13 }
   0x5   :  { %s367_s14 = scalar_lea.vmem %s19_s13, 256  ;;  %p372_p1 = scmp.lt.s32.totalorder %s19_s13, %s19_s13 }
   0x6   :  { %p368_p0 = scmp.ne.s32.totalorder %s19_s13, %s367_s14  ;;  %p373_p2 = scmp.lt.s32.totalorder %s367_s14, %s367_s14 }
   0x8   :  { %p374_p3 = por %p373_p2, %p372_p1 }
   0xa   :  { %p375_p4 = pnand %p374_p3, %p368_p0 }
   0xc   :  { %378 = shalt.err (!%p375_p4)
}
   0xd   :  { %s448_s15 = smov 128   ;;  %s449_s16 = smov 8  }
   0xe   :  { %24 = dma.hbm_to_vmem [thread:$0]  %s517_s0, 256, %s19_s13, [#allocation3], %s448_s15, %s448_s15, %s449_s16  }
   0xf   :  { %s450_s19 = smov [#allocation5]  }
  0x10   :  { %s30_s20 = sshll.u32 %s450_s19, 4  ;;  %s31_s20 = int_to_ptr.vmem [resolvable:$true] %s30_s20 }
  0x11   :  { %s387_s21 = scalar_lea.vmem %s31_s20, 256  ;;  %p392_p6 = scmp.lt.s32.totalorder %s31_s20, %s31_s20 }
  0x12   :  { %p388_p5 = scmp.ne.s32.totalorder %s31_s20, %s387_s21  ;;  %p393_p7 = scmp.lt.s32.totalorder %s387_s21, %s387_s21 }
  0x14   :  { %p394_p8 = por %p393_p7, %p392_p6 }
  0x16   :  { %p395_p9 = pnand %p394_p8, %p388_p5 }
  0x18   :  { %398 = shalt.err (!%p395_p9)
}
  0x19   :  { %36 = dma.hbm_to_vmem [thread:$0]  %s518_s1, 256, %s31_s20, [#allocation6], %s448_s15, %s448_s15, %s449_s16  }
  0x1a   :  { %439 = dma.done.wait [#allocation3], 256  }
  0x1b   :  { %440 = vsyncadd [#allocation3], 4294967040 }
  0x1c   :  { %441 = dma.done.wait [#allocation6], 256  }
  0x1d   :  { %442 = vsyncadd [#allocation6], 4294967040  ;;  %v451_v0 = vmov 0.0   ;;  %vm452_vm0 = vmmov 0   ;;  %v50_v1 = vld [vmem:[#allocation5] sm:$0xff]  ;;  %vm54_vm1 = vcmask 261120  }
  0x1e   :  { %319 = vmatprep.subr.bf16.mxu0 %v451_v0  ;;  %325 = vmatprep.subr.bf16.mxu1 %v451_v0  ;;  %v51_v2 = vld [vmem:[#allocation5 + $0x8] sm:$0xff]  ;;  %v44_v3 = vld [vmem:[#allocation2] sm:$0xff]  ;;  %v52_v4 = vpack.c.bf16 %v50_v1, %v50_v1  ;;  %v45_v6 = vld [vmem:[#allocation2 + $0x8] sm:$0xff]  ;;  %vm147_vm2 = vcmask 64512   ;;  %vm181_vm3 = vcmask 1043456   ;;  %s453_s0 = smov [#allocation8]  }
  0x1f   :  { %321 = vmatprep.mubr.msk.bf16.mxu0 %vm452_vm0, %v451_v0  ;;  %327 = vmatprep.mubr.msk.bf16.mxu1 %vm452_vm0, %v451_v0  ;;  %v53_v5 = vpack.c.bf16 %v51_v2, %v51_v2  ;;  %v46_v9 = vmul.f32 0.17677669, %v44_v3  ;;  %v47_v10 = vmul.f32 0.17677669, %v45_v6  ;;  %s290_s1 = sshll.u32 %s453_s0, 4  ;;  %s291_s1 = int_to_ptr.vmem [resolvable:$true] %s290_s1 }
  0x20   :  { %v59_v7 = vsel %vm54_vm1, %v52_v4, 0  ;;  %v182_v33 = vsel %vm181_vm3, %v52_v4, 0  ;;  %s399_s24 = scalar_lea.vmem %s291_s1, 256  ;;  %p404_p11 = scmp.lt.s32.totalorder %s291_s1, %s291_s1 }
  0x21   :  { %v105_v8 = vsel %vm54_vm1, %v53_v5, 0  ;;  %320 = vmatpush3.bf16.xpose.msra.mxu0 %v59_v7  ;;  %v48_v11 = vpack.c.bf16 %v46_v9, %v46_v9  ;;  %v49_v12 = vpack.c.bf16 %v47_v10, %v47_v10  ;;  %v227_v34 = vsel %vm181_vm3, %v53_v5, 0  ;;  %p400_p10 = scmp.ne.s32.totalorder %s291_s1, %s399_s24  ;;  %p405_p12 = scmp.lt.s32.totalorder %s399_s24, %s399_s24 }
  0x22   :  { %326 = vmatpush3.bf16.xpose.msra.mxu1 %v105_v8  ;;  %331 = vmatprep.subr.bf16.mxu0 %v451_v0 }
  0x23   :  { %337 = vmatprep.subr.bf16.mxu1 %v451_v0  ;;  %p406_p13 = por %p405_p12, %p404_p11 }
  0x25   :  { %p407_p0 = pnand %p406_p13, %p400_p10 }
  0x28   :  { %322 = vmatmul.mubr.msk.bf16.vlgmr.msra.gmra.mxu0 %vm54_vm1, %v48_v11 }
  0x29   :  { %328 = vmatmul.mubr.msk.bf16.vlgmr.msra.gmra.mxu1 %vm54_vm1, %v49_v12  ;;  %333 = vmatprep.mubr.msk.bf16.mxu0 %vm452_vm0, %v451_v0 }
  0x2a   :  { %339 = vmatprep.mubr.msk.bf16.mxu1 %vm452_vm0, %v451_v0  ;;  %332 = vmatpush3.bf16.msra.mxu0 %v182_v33 }
  0x2b   :  { %338 = vmatpush3.bf16.msra.mxu1 %v227_v34 }
  0xe8   :  { %v95_v13 = vpop.f32.mrf.mxu0 }
  0xe9   :  { %v141_v14 = vpop.f32.mrf.mxu1  ;;  %v148_v15 = vsel %vm147_vm2, %v95_v13, -inf }
  0xea   :  { %149 = vmax.xlane.f32.xlu0 %v148_v15  ;;  %v323_v17 = vpop.f32.mrf.mxu0  ;;  %v151_v18 = vsel %vm147_vm2, %v141_v14, -inf }
  0xeb   :  { %v329_v16 = vpop.f32.mrf.mxu1 }
  0xec   :  { %v98_v19 = vpop.f32.mrf.mxu0 }
  0xed   :  { %v144_v20 = vpop.f32.mrf.mxu1 }
  0xee   :  { %152 = vmax.xlane.f32.xlu0 %v151_v18  ;;  %v324_v22 = vpop.f32.mrf.mxu0 }
  0xef   :  { %v330_v21 = vpop.f32.mrf.mxu1 }
 0x173   :  { %v150_v23 = vpop.xlane.xlu0 %149 }
 0x174   :  { %v154_v24 = vsub.f32 %v95_v13, %v150_v23 }
 0x176   :  { %v156_v25 = vmul.f32 1.442695, %v154_v24 }
 0x177   :  { %v153_v26 = vpop.xlane.xlu0 %152 }
 0x178   :  { %351 = vpow2.f32 %v156_v25  ;;  %v155_v27 = vsub.f32 %v141_v14, %v153_v26 }
 0x17a   :  { %v158_v28 = vmul.f32 1.442695, %v155_v27 }
 0x17c   :  { %353 = vpow2.f32 %v158_v28 }
 0x185   :  { %v352_v29 = vpop.eup %351 }
 0x186   :  { %v160_v30 = vsel %vm147_vm2, %v352_v29, 0.0 }
 0x187   :  { %161 = vadd.xlane.f32.xlu1 %v160_v30 }
 0x189   :  { %v354_v31 = vpop.eup %353 }
 0x18a   :  { %v163_v32 = vsel %vm147_vm2, %v354_v31, 0.0 }
 0x18b   :  { %164 = vadd.xlane.f32.xlu1 %v163_v32 }
 0x210   :  { %v162_v35 = vpop.xlane.xlu1 %161 }
 0x211   :  { %355 = vrcp.f32 %v162_v35 }
 0x214   :  { %v165_v36 = vpop.xlane.xlu1 %164 }
 0x215   :  { %357 = vrcp.f32 %v165_v36 }
 0x21e   :  { %v356_v37 = vpop.eup %355 }
 0x21f   :  { %v168_v38 = vmul.f32 %v356_v37, %v162_v35 }
 0x221   :  { %v170_v39 = vsub.f32 2.0, %v168_v38 }
 0x222   :  { %v358_v40 = vpop.eup %357 }
 0x223   :  { %v172_v41 = vmul.f32 %v356_v37, %v170_v39  ;;  %v169_v42 = vmul.f32 %v358_v40, %v165_v36 }
 0x225   :  { %v174_v43 = vmul.f32 %v352_v29, %v172_v41  ;;  %v171_v44 = vsub.f32 2.0, %v169_v42 }
 0x227   :  { %v176_v45 = vpack.c.bf16 %v174_v43, %v174_v43  ;;  %271 = vst.msk [vmem:[#allocation8] sm:$0xff] %vm147_vm2, %v174_v43  ;;  %v173_v46 = vmul.f32 %v358_v40, %v171_v44 }
 0x229   :  { %v175_v47 = vmul.f32 %v354_v31, %v173_v46  ;;  %334 = vmatmul.mubr.msk.bf16.vlgmr.msra.gmra.mxu0 %vm147_vm2, %v176_v45 }
 0x22b   :  { %v177_v48 = vpack.c.bf16 %v175_v47, %v175_v47  ;;  %272 = vst.msk [vmem:[#allocation8 + $0x8] sm:$0xff] %vm147_vm2, %v175_v47 }
 0x22d   :  { %340 = vmatmul.mubr.msk.bf16.vlgmr.msra.gmra.mxu1 %vm147_vm2, %v177_v48 }
 0x22e   :  { %410 = shalt.err (!%p407_p0)
}
 0x22f   :  { %296 = dma.vmem_to_hbm [thread:$0]  %s291_s1, 256, %s520_s3, [#allocation9], %s448_s15, %s448_s15, %s449_s16  }
 0x230   :  { %s454_s27 = smov [#allocation7]  }
 0x231   :  { %s278_s28 = sshll.u32 %s454_s27, 4  ;;  %s279_s28 = int_to_ptr.vmem [resolvable:$true] %s278_s28 }
 0x232   :  { %s419_s29 = scalar_lea.vmem %s279_s28, 256  ;;  %p424_p2 = scmp.lt.s32.totalorder %s279_s28, %s279_s28 }
 0x233   :  { %p420_p1 = scmp.ne.s32.totalorder %s279_s28, %s419_s29  ;;  %p425_p3 = scmp.lt.s32.totalorder %s419_s29, %s419_s29 }
 0x235   :  { %p426_p4 = por %p425_p3, %p424_p2 }
 0x237   :  { %p427_p5 = pnand %p426_p4, %p420_p1 }
 0x2e9   :  { %v218_v49 = vpop.f32.mrf.mxu0 }
 0x2ea   :  { %269 = vst.msk [vmem:[#allocation7] sm:$0xff] %vm54_vm1, %v218_v49 }
 0x2eb   :  { %v335_v50 = vpop.f32.mrf.mxu0 }
 0x2ed   :  { %v221_v51 = vpop.f32.mrf.mxu0  ;;  %v263_v52 = vpop.f32.mrf.mxu1 }
 0x2ee   :  { %270 = vst.msk [vmem:[#allocation7 + $0x8] sm:$0xff] %vm54_vm1, %v263_v52 }
 0x2ef   :  { %v336_v53 = vpop.f32.mrf.mxu0  ;;  %v341_v54 = vpop.f32.mrf.mxu1 }
 0x2f0   :  { %430 = shalt.err (!%p427_p5)
}
 0x2f1   :  { %284 = dma.vmem_to_hbm [thread:$0]  %s279_s28, 256, %s519_s2, [#allocation4], %s448_s15, %s448_s15, %s449_s16   ;;  %v266_v55 = vpop.f32.mrf.mxu1 }
 0x2f3   :  { %v342_v56 = vpop.f32.mrf.mxu1 }
 0x2f4   :  { %443 = dma.done.wait [#allocation4], 256  }
 0x2f5   :  { %444 = vsyncadd [#allocation4], 4294967040 }
 0x2f6   :  { %445 = dma.done.wait [#allocation9], 256  }
 0x2f7   :  { %446 = vsyncadd [#allocation9], 4294967040 }
 0x2f8   :  { %303 = vsyncpa [#allocation3], 1 }
 0x2f9   :  { %304 = vsyncpa [#allocation6], 1 }
 0x2fa   :  { %305 = vsyncpa [#allocation4], 1 }
 0x2fb   :  { %306 = vsyncpa [#allocation9], 1 }

</bundles_post_ra>
